<compile_context>
chip_gen: v7x
topology: tpu7x:2x2x1
jax: 0.10.0
libtpu: 0.0.40
codegen_flags: <defaults>
</compile_context>

<pallas_src>
import functools

import jax
import jax.numpy as jnp
from jax.experimental import pallas as pl
from jax.experimental.pallas import tpu as pltpu

_LANES = 128


def _round_up(n, m):
    return ((n + m - 1) // m) * m


def _actor_kernel(x_ref, w1_ref, b1_ref, w2_ref, b2_ref, w3_ref, b3_ref,
                  w4_ref, b4_ref, out_ref, *, action_lim):
    # fc1 -> relu   (bf16 MXU matmul, f32 accumulate; bias/ReLU in f32 on VPU)
    h = jnp.dot(x_ref[...].astype(jnp.bfloat16), w1_ref[...],
                preferred_element_type=jnp.float32)
    h = jnp.maximum(h + b1_ref[...], 0.0)
    # fc2 -> relu
    h = jnp.dot(h.astype(jnp.bfloat16), w2_ref[...],
                preferred_element_type=jnp.float32)
    h = jnp.maximum(h + b2_ref[...], 0.0)
    # fc3 -> relu
    h = jnp.dot(h.astype(jnp.bfloat16), w3_ref[...],
                preferred_element_type=jnp.float32)
    h = jnp.maximum(h + b3_ref[...], 0.0)
    # fc4 -> tanh -> * action_lim   (output lane-padded to 128; tanh on EUP)
    h = jnp.dot(h.astype(jnp.bfloat16), w4_ref[...],
                preferred_element_type=jnp.float32)
    h = jnp.tanh(h + b4_ref[...]) * action_lim
    out_ref[...] = h.astype(out_ref.dtype)


def actor_forward(x, params, action_lim, *, tile_b=128):
    """x: (B, nb_states) f32.  params: bf16 (in,out) weights, f32 (1,out) biases."""
    B, nb_states = x.shape
    h1 = params["w1"].shape[1]
    h2 = params["w2"].shape[1]
    h3 = params["w3"].shape[1]
    nb_actions = params["w4"].shape[1]

    # --- lane-dense final layer: pad nb_actions up to a multiple of 128 ---
    a_pad = _round_up(max(nb_actions, _LANES), _LANES)
    w4, b4 = params["w4"], params["b4"]
    if a_pad != nb_actions:
        w4 = jnp.pad(w4, ((0, 0), (0, a_pad - nb_actions)))
        b4 = jnp.pad(b4, ((0, 0), (0, a_pad - nb_actions)))

    # --- batch tiling (pad batch to a multiple of the tile) ---
    tb = min(tile_b, _round_up(B, 8))
    b_pad = _round_up(B, tb)
    if b_pad != B:
        x = jnp.pad(x, ((0, b_pad - B), (0, 0)))
    grid = (b_pad // tb,)

    def resident(arr):
        # Constant block index => single DMA, stays resident in VMEM across tiles.
        return pl.BlockSpec(arr.shape, lambda i: (0, 0))

    in_specs = [
        pl.BlockSpec((tb, nb_states), lambda i: (i, 0)),       # x tile
        resident(params["w1"]), resident(params["b1"]),
        resident(params["w2"]), resident(params["b2"]),
        resident(params["w3"]), resident(params["b3"]),
        resident(w4), resident(b4),
    ]
    out_spec = pl.BlockSpec((tb, a_pad), lambda i: (i, 0))

    # --- advisory cost estimate for XLA's scheduler ---
    flops = 2 * b_pad * (nb_states * h1 + h1 * h2 + h2 * h3 + h3 * a_pad)
    weight_bytes = sum(int(w.size) * w.dtype.itemsize
                       for w in (params["w1"], params["w2"], params["w3"], w4))
    bias_bytes = sum(int(b.size) * b.dtype.itemsize
                     for b in (params["b1"], params["b2"], params["b3"], b4))
    bytes_accessed = (int(x.size) * x.dtype.itemsize + weight_bytes + bias_bytes
                      + b_pad * a_pad * 4)
    cost = pl.CostEstimate(flops=flops,
                           transcendentals=b_pad * a_pad,
                           bytes_accessed=bytes_accessed)

    out = pl.pallas_call(
        functools.partial(_actor_kernel, action_lim=float(action_lim)),
        out_shape=jax.ShapeDtypeStruct((b_pad, a_pad), jnp.float32),
        grid_spec=pltpu.PrefetchScalarGridSpec(
            num_scalar_prefetch=0,
            grid=grid,
            in_specs=in_specs,
            out_specs=out_spec),
        compiler_params=pltpu.CompilerParams(
            dimension_semantics=("parallel",)),
        cost_estimate=cost,
    )(x, params["w1"], params["b1"], params["w2"], params["b2"],
      params["w3"], params["b3"], w4, b4)

    return out[:B, :nb_actions]


def init_actor_params(key, nb_states, nb_actions,
                      hidden1, hidden2, hidden3, init_w=0.003):
    """Deterministic init mirroring the PyTorch module's init scheme.

    fc1..fc3 weights: uniform(-1/sqrt(fan_in), 1/sqrt(fan_in))   (fanin_init)
    fc4 weight:       uniform(-init_w, init_w)
    biases:           PyTorch Linear default, uniform(-1/sqrt(fan_in), ...)
    Weights are stored (in, out), cast to bf16 (MXU-native); biases stay f32.
    """
    keys = jax.random.split(key, 8)
    dims = [(nb_states, hidden1), (hidden1, hidden2),
            (hidden2, hidden3), (hidden3, nb_actions)]
    params = {}
    for i, (fan_in, fan_out) in enumerate(dims, start=1):
        bound_w = (1.0 / jnp.sqrt(float(fan_in))) if i < 4 else init_w
        bound_b = 1.0 / jnp.sqrt(float(fan_in))
        w = jax.random.uniform(keys[2 * (i - 1)], (fan_in, fan_out),
                               minval=-bound_w, maxval=bound_w,
                               dtype=jnp.float32)
        b = jax.random.uniform(keys[2 * (i - 1) + 1], (1, fan_out),
                               minval=-bound_b, maxval=bound_b,
                               dtype=jnp.float32)
        params[f"w{i}"] = w.astype(jnp.bfloat16)
        params[f"b{i}"] = b
    return params


def actor_reference_matched(x, params, action_lim):
    """Same arithmetic as the kernel: bf16 matmul operands, f32 accumulation."""
    def layer(h, w, b):
        return jnp.dot(h.astype(jnp.bfloat16), w.astype(jnp.bfloat16),
                       preferred_element_type=jnp.float32) + b
    h = jnp.maximum(layer(x, params["w1"], params["b1"]), 0.0)
    h = jnp.maximum(layer(h, params["w2"], params["b2"]), 0.0)
    h = jnp.maximum(layer(h, params["w3"], params["b3"]), 0.0)
    return jnp.tanh(layer(h, params["w4"], params["b4"])) * action_lim


def actor_reference_f32(x, params, action_lim):
    """Pure f32 reference of the original PyTorch forward (weights upcast)."""
    def layer(h, w, b):
        return h @ w.astype(jnp.float32) + b
    h = jnp.maximum(layer(x, params["w1"], params["b1"]), 0.0)
    h = jnp.maximum(layer(h, params["w2"], params["b2"]), 0.0)
    h = jnp.maximum(layer(h, params["w3"], params["b3"]), 0.0)
    return jnp.tanh(layer(h, params["w4"], params["b4"])) * action_lim


if __name__ == "__main__":
    # Small instantiation of Actor(nb_states, nb_actions, action_lim,
    # hidden1, hidden2, hidden3) — scaled down from the 1024/512/256 defaults,
    # but with a replay-style batch so the batch grid actually tiles (2 tiles,
    # exercising the "parallel" megacore axis and the resident-weight reuse).
    B = 256
    nb_states, nb_actions = 32, 8
    hidden1, hidden2, hidden3 = 128, 128, 128
    action_lim = 2.0

    key = jax.random.PRNGKey(0)
    k_params, k_x = jax.random.split(key)
    params = init_actor_params(k_params, nb_states, nb_actions,
                               hidden1, hidden2, hidden3)
    x = jax.random.normal(k_x, (B, nb_states), dtype=jnp.float32)

    # Jit the whole forward so the pad / slice plumbing fuses around the
    # pallas_call into a single compiled program.
    fwd = jax.jit(functools.partial(actor_forward,
                                    action_lim=action_lim, tile_b=128))
    out = jax.block_until_ready(fwd(x, params))
    assert out.shape == (B, nb_actions)

    # Tight check vs. a reference using identical (bf16-operand) arithmetic.
    ref_matched = actor_reference_matched(x, params, action_lim)
    assert jnp.allclose(out, ref_matched, atol=1e-3, rtol=1e-3)

    # Loose semantic check vs. the pure-f32 PyTorch-equivalent forward
    # (bf16 matmul operands introduce ~0.4%/layer rounding).
    ref_f32 = actor_reference_f32(x, params, action_lim)
    assert jnp.allclose(out, ref_f32, atol=1e-1, rtol=1e-1)

    print("KERNEL_OK")
</pallas_src>

<mosaic_0001>
module attributes {stable_mosaic.version = 11 : i64} {
  func.func @_actor_kernel(%arg0: i32, %arg1: memref<128x32xf32, #tpu.memory_space<vmem>>, %arg2: memref<32x128xbf16, #tpu.memory_space<vmem>>, %arg3: memref<1x128xf32, #tpu.memory_space<vmem>>, %arg4: memref<128x128xbf16, #tpu.memory_space<vmem>>, %arg5: memref<1x128xf32, #tpu.memory_space<vmem>>, %arg6: memref<128x128xbf16, #tpu.memory_space<vmem>>, %arg7: memref<1x128xf32, #tpu.memory_space<vmem>>, %arg8: memref<128x128xbf16, #tpu.memory_space<vmem>>, %arg9: memref<1x128xf32, #tpu.memory_space<vmem>>, %arg10: memref<128x128xf32, #tpu.memory_space<vmem>>) attributes {dimension_semantics = [#tpu.dimension_semantics<parallel>], iteration_bounds = array<i64: 2>, scalar_prefetch = 0 : i64, scratch_operands = 0 : i64, tpu.core_type = #tpu.core_type<tc>, window_params = [{transform_indices = @transform_0, window_bounds = array<i64: 128, 32>}, {pipeline_mode = #tpu.pipeline_mode<synchronous>, transform_indices = @transform_1, window_bounds = array<i64: 32, 128>}, {pipeline_mode = #tpu.pipeline_mode<synchronous>, transform_indices = @transform_2, window_bounds = array<i64: 1, 128>}, {pipeline_mode = #tpu.pipeline_mode<synchronous>, transform_indices = @transform_3, window_bounds = array<i64: 128, 128>}, {pipeline_mode = #tpu.pipeline_mode<synchronous>, transform_indices = @transform_4, window_bounds = array<i64: 1, 128>}, {pipeline_mode = #tpu.pipeline_mode<synchronous>, transform_indices = @transform_5, window_bounds = array<i64: 128, 128>}, {pipeline_mode = #tpu.pipeline_mode<synchronous>, transform_indices = @transform_6, window_bounds = array<i64: 1, 128>}, {pipeline_mode = #tpu.pipeline_mode<synchronous>, transform_indices = @transform_7, window_bounds = array<i64: 128, 128>}, {pipeline_mode = #tpu.pipeline_mode<synchronous>, transform_indices = @transform_8, window_bounds = array<i64: 1, 128>}, {transform_indices = @transform_9, window_bounds = array<i64: 128, 128>}]} {
    %c0 = arith.constant 0 : index
    %c0_0 = arith.constant 0 : index
    %0 = vector.load %arg1[%c0, %c0_0] : memref<128x32xf32, #tpu.memory_space<vmem>>, vector<128x32xf32>
    %1 = arith.truncf %0 : vector<128x32xf32> to vector<128x32xbf16>
    %c0_1 = arith.constant 0 : index
    %c0_2 = arith.constant 0 : index
    %2 = vector.load %arg2[%c0_1, %c0_2] : memref<32x128xbf16, #tpu.memory_space<vmem>>, vector<32x128xbf16>
    %cst = arith.constant dense<0.000000e+00> : vector<128x128xf32>
    %3 = tpu.matmul %1, %2, %cst {dimension_numbers = #tpu.dot_dimension_numbers<[1], [0], [0], [1], [0, 0, 1, 1], [], []>} : vector<128x32xbf16>, vector<32x128xbf16>, vector<128x128xf32> -> vector<128x128xf32>
    %c0_3 = arith.constant 0 : index
    %c0_4 = arith.constant 0 : index
    %4 = vector.load %arg3[%c0_3, %c0_4] : memref<1x128xf32, #tpu.memory_space<vmem>>, vector<1x128xf32>
    %5 = vector.broadcast %4 : vector<1x128xf32> to vector<128x128xf32>
    %6 = arith.addf %3, %5 : vector<128x128xf32>
    %cst_5 = arith.constant 0.000000e+00 : f32
    %7 = vector.broadcast %cst_5 : f32 to vector<128x128xf32>
    %8 = arith.maximumf %6, %7 : vector<128x128xf32>
    %9 = arith.truncf %8 : vector<128x128xf32> to vector<128x128xbf16>
    %c0_6 = arith.constant 0 : index
    %c0_7 = arith.constant 0 : index
    %10 = vector.load %arg4[%c0_6, %c0_7] : memref<128x128xbf16, #tpu.memory_space<vmem>>, vector<128x128xbf16>
    %cst_8 = arith.constant dense<0.000000e+00> : vector<128x128xf32>
    %11 = tpu.matmul %9, %10, %cst_8 {dimension_numbers = #tpu.dot_dimension_numbers<[1], [0], [0], [1], [0, 0, 1, 1], [], []>} : vector<128x128xbf16>, vector<128x128xbf16>, vector<128x128xf32> -> vector<128x128xf32>
    %c0_9 = arith.constant 0 : index
    %c0_10 = arith.constant 0 : index
    %12 = vector.load %arg5[%c0_9, %c0_10] : memref<1x128xf32, #tpu.memory_space<vmem>>, vector<1x128xf32>
    %13 = vector.broadcast %12 : vector<1x128xf32> to vector<128x128xf32>
    %14 = arith.addf %11, %13 : vector<128x128xf32>
    %cst_11 = arith.constant 0.000000e+00 : f32
    %15 = vector.broadcast %cst_11 : f32 to vector<128x128xf32>
    %16 = arith.maximumf %14, %15 : vector<128x128xf32>
    %17 = arith.truncf %16 : vector<128x128xf32> to vector<128x128xbf16>
    %c0_12 = arith.constant 0 : index
    %c0_13 = arith.constant 0 : index
    %18 = vector.load %arg6[%c0_12, %c0_13] : memref<128x128xbf16, #tpu.memory_space<vmem>>, vector<128x128xbf16>
    %cst_14 = arith.constant dense<0.000000e+00> : vector<128x128xf32>
    %19 = tpu.matmul %17, %18, %cst_14 {dimension_numbers = #tpu.dot_dimension_numbers<[1], [0], [0], [1], [0, 0, 1, 1], [], []>} : vector<128x128xbf16>, vector<128x128xbf16>, vector<128x128xf32> -> vector<128x128xf32>
    %c0_15 = arith.constant 0 : index
    %c0_16 = arith.constant 0 : index
    %20 = vector.load %arg7[%c0_15, %c0_16] : memref<1x128xf32, #tpu.memory_space<vmem>>, vector<1x128xf32>
    %21 = vector.broadcast %20 : vector<1x128xf32> to vector<128x128xf32>
    %22 = arith.addf %19, %21 : vector<128x128xf32>
    %cst_17 = arith.constant 0.000000e+00 : f32
    %23 = vector.broadcast %cst_17 : f32 to vector<128x128xf32>
    %24 = arith.maximumf %22, %23 : vector<128x128xf32>
    %25 = arith.truncf %24 : vector<128x128xf32> to vector<128x128xbf16>
    %c0_18 = arith.constant 0 : index
    %c0_19 = arith.constant 0 : index
    %26 = vector.load %arg8[%c0_18, %c0_19] : memref<128x128xbf16, #tpu.memory_space<vmem>>, vector<128x128xbf16>
    %cst_20 = arith.constant dense<0.000000e+00> : vector<128x128xf32>
    %27 = tpu.matmul %25, %26, %cst_20 {dimension_numbers = #tpu.dot_dimension_numbers<[1], [0], [0], [1], [0, 0, 1, 1], [], []>} : vector<128x128xbf16>, vector<128x128xbf16>, vector<128x128xf32> -> vector<128x128xf32>
    %c0_21 = arith.constant 0 : index
    %c0_22 = arith.constant 0 : index
    %28 = vector.load %arg9[%c0_21, %c0_22] : memref<1x128xf32, #tpu.memory_space<vmem>>, vector<1x128xf32>
    %29 = vector.broadcast %28 : vector<1x128xf32> to vector<128x128xf32>
    %30 = arith.addf %27, %29 : vector<128x128xf32>
    %31 = math.tanh %30 : vector<128x128xf32>
    %cst_23 = arith.constant 2.000000e+00 : f32
    %32 = vector.broadcast %cst_23 : f32 to vector<128x128xf32>
    %33 = arith.mulf %31, %32 : vector<128x128xf32>
    %c0_24 = arith.constant 0 : index
    %c0_25 = arith.constant 0 : index
    %34 = vector.load %arg10[%c0_24, %c0_25] : memref<128x128xf32, #tpu.memory_space<vmem>>, vector<128x128xf32>
    tpu.vector_store %arg10[%c0_24, %c0_25], %33 {strides = array<i32>} : memref<128x128xf32, #tpu.memory_space<vmem>>, vector<128x128xf32>,
    return
  }
  func.func @transform_0(%arg0: i32) -> (i32, i32) {
    %c0_i32 = arith.constant 0 : i32
    %c0_i32_0 = arith.constant 0 : i32
    return %arg0, %c0_i32 : i32, i32
  }
  func.func @transform_1(%arg0: i32) -> (i32, i32) {
    %c0_i32 = arith.constant 0 : i32
    %c0_i32_0 = arith.constant 0 : i32
    %c0_i32_1 = arith.constant 0 : i32
    return %c0_i32, %c0_i32_0 : i32, i32
  }
  func.func @transform_2(%arg0: i32) -> (i32, i32) {
    %c0_i32 = arith.constant 0 : i32
    %c0_i32_0 = arith.constant 0 : i32
    %c0_i32_1 = arith.constant 0 : i32
    return %c0_i32, %c0_i32_0 : i32, i32
  }
  func.func @transform_3(%arg0: i32) -> (i32, i32) {
    %c0_i32 = arith.constant 0 : i32
    %c0_i32_0 = arith.constant 0 : i32
    %c0_i32_1 = arith.constant 0 : i32
    return %c0_i32, %c0_i32_0 : i32, i32
  }
  func.func @transform_4(%arg0: i32) -> (i32, i32) {
    %c0_i32 = arith.constant 0 : i32
    %c0_i32_0 = arith.constant 0 : i32
    %c0_i32_1 = arith.constant 0 : i32
    return %c0_i32, %c0_i32_0 : i32, i32
  }
  func.func @transform_5(%arg0: i32) -> (i32, i32) {
    %c0_i32 = arith.constant 0 : i32
    %c0_i32_0 = arith.constant 0 : i32
    %c0_i32_1 = arith.constant 0 : i32
    return %c0_i32, %c0_i32_0 : i32, i32
  }
  func.func @transform_6(%arg0: i32) -> (i32, i32) {
    %c0_i32 = arith.constant 0 : i32
    %c0_i32_0 = arith.constant 0 : i32
    %c0_i32_1 = arith.constant 0 : i32
    return %c0_i32, %c0_i32_0 : i32, i32
  }
  func.func @transform_7(%arg0: i32) -> (i32, i32) {
    %c0_i32 = arith.constant 0 : i32
    %c0_i32_0 = arith.constant 0 : i32
    %c0_i32_1 = arith.constant 0 : i32
    return %c0_i32, %c0_i32_0 : i32, i32
  }
  func.func @transform_8(%arg0: i32) -> (i32, i32) {
    %c0_i32 = arith.constant 0 : i32
    %c0_i32_0 = arith.constant 0 : i32
    %c0_i32_1 = arith.constant 0 : i32
    return %c0_i32, %c0_i32_0 : i32, i32
  }
  func.func @transform_9(%arg0: i32) -> (i32, i32) {
    %c0_i32 = arith.constant 0 : i32
    %c0_i32_0 = arith.constant 0 : i32
    return %arg0, %c0_i32 : i32, i32
  }
}

</mosaic_0001>

<bundles_post_ra>
// kernel: actor_forward.1
= control target key start
LH: loop header
LB: loop body
LE: loop exit
PB: predicated region body
PF: predicated region fallthrough
CT: control target
= control target key end

     0   :  { %s1549_s30 = smov 0   ;;  %s1761_s0 = inlined_call_operand.vmem [shape: f32[256,32], index: 0, kind: input, shape index: {}]   ;;  %s1762_s1 = inlined_call_operand.vmem [shape: bf16[32,128], index: 1, kind: input, shape index: {}]   ;;  %s1763_s2 = inlined_call_operand.vmem [shape: f32[1,128], index: 2, kind: input, shape index: {}]   ;;  %s1764_s3 = inlined_call_operand.vmem [shape: bf16[128,128], index: 3, kind: input, shape index: {}]   ;;  %s1765_s4 = inlined_call_operand.vmem [shape: f32[1,128], index: 4, kind: input, shape index: {}]   ;;  %s1766_s5 = inlined_call_operand.vmem [shape: bf16[128,128], index: 5, kind: input, shape index: {}]   ;;  %s1767_s6 = inlined_call_operand.vmem [shape: f32[1,128], index: 6, kind: input, shape index: {}]   ;;  %s1768_s7 = inlined_call_operand.vmem [shape: bf16[128,128], index: 7, kind: input, shape index: {}]   ;;  %s1769_s8 = inlined_call_operand.vmem [shape: f32[1,128], index: 8, kind: input, shape index: {}]   ;;  %s1770_s9 = inlined_call_operand.vmem [shape: f32[256,128], index: 9, kind: output, shape index: {}]  }
   0x1 LB: > { %s1186_s10 = sadd.s32 4294967295, %s1497_s30   ;;  %p1190_p0 = scmp.ge.s32.totalorder %s1497_s30, 1  ;;  %s1497_s30 = sphi %s1549_s30, %s19_s30  }
   0x2   : > { %p288_p1 = scmp.lt.s32.totalorder %s1497_s30, 3 }
   0x4   : > { %p289_p2 = pnand %p1190_p0, %p288_p1 }
   0x5   : > { %v1433_v0 = vld [vmem:[%s1762_s1] sm:$0xff] (!%p289_p2)   ;;  %s1191_s13 = sshll.u32 (!%p289_p2), %s1186_s10, 4  ;;  %v1434_v1 = vld [vmem:[%s1762_s1 + $0x8] sm:$0xff] (!%p289_p2)   ;;  %v1437_v4 = vld [vmem:[%s1764_s3 + $0x10] sm:$0xff] (!%p289_p2)   ;;  %vm384_vm0 = vcmask (!%p289_p2), 261120  }
   0x6   : > { %292 = sbr.rel (%p289_p2) target bundleno = 941 (0x3ad), region = 56  ;;  %p325_p3 = scmp.lt.s32.totalorder (!%p289_p2), %s1191_s13, 31  ;;  %1293 = vmatprep.subr.bf16.mxu0 (!%p289_p2), %v1433_v0  ;;  %v1435_v2 = vld [vmem:[%s1764_s3] sm:$0xff] (!%p289_p2)   ;;  %v1436_v3 = vld [vmem:[%s1764_s3 + $0x8] sm:$0xff] (!%p289_p2)   ;;  %v1438_v14 = vld [vmem:[%s1764_s3 + $0x18] sm:$0xff] (!%p289_p2)  }
   0x7   : > { %1294 = vmatpush3.bf16.msra.mxu0 (!%p289_p2), %v1433_v0  ;;  %1313 = vmatprep.subr.bf16.mxu1 (!%p289_p2), %v1435_v2  ;;  %v1439_v18 = vld [vmem:[%s1764_s3 + $0x20] sm:$0xff] (!%p289_p2)   ;;  %v1440_v22 = vld [vmem:[%s1764_s3 + $0x28] sm:$0xff] (!%p289_p2)   ;;  %v1441_v32 = vld [vmem:[%s1764_s3 + $0x30] sm:$0xff] (!%p289_p2)  }
   0x8   : > { %1295 = vmatprep.subr.bf16.mxu0 (!%p289_p2), %v1434_v1  ;;  %1314 = vmatpush3.bf16.msra.mxu1 (!%p289_p2), %v1435_v2  ;;  %v1442_v33 = vld [vmem:[%s1764_s3 + $0x38] sm:$0xff] (!%p289_p2)   ;;  %v1443_v34 = vld [vmem:[%s1766_s5] sm:$0xff] (!%p289_p2)   ;;  %v1444_v35 = vld [vmem:[%s1766_s5 + $0x8] sm:$0xff] (!%p289_p2)  }
   0x9   : > { %1315 = vmatprep.subr.bf16.mxu1 (!%p289_p2), %v1436_v3  ;;  %v1445_v36 = vld [vmem:[%s1766_s5 + $0x10] sm:$0xff] (!%p289_p2)   ;;  %v1446_v37 = vld [vmem:[%s1766_s5 + $0x18] sm:$0xff] (!%p289_p2)   ;;  %v1447_v38 = vld [vmem:[%s1766_s5 + $0x20] sm:$0xff] (!%p289_p2)  }
   0xa   : > { %v1448_v39 = vld [vmem:[%s1766_s5 + $0x28] sm:$0xff] (!%p289_p2)   ;;  %v1195_v40 = vld [vmem:[%s1763_s2] ss:$0 sm:$0xff] (!%p289_p2) }
   0xb   : > { %1296 = vmatpush3.bf16.msra.mxu0 (!%p289_p2), %v1434_v1 }
   0xc   : > { %1316 = vmatpush3.bf16.msra.mxu1 (!%p289_p2), %v1436_v3  ;;  %1345 = vmatprep.subr.bf16.mxu0 (!%p289_p2), %v1443_v34 }
   0xd   : > { %s1772_s13 = smov (!%p325_p3, %s1191_s13), 31  ;;  %1317 = vmatprep.subr.bf16.mxu1 %v1437_v4 }
   0xe   : > { %s1192_s20 = sshll.u32 %s1772_s13, 3 }
   0xf   : > { %s1577_s23 = scalar_lea.vmem %s1761_s0, %s1192_s20  ;;  %s1732_s24 = scalar_lea.vmem %s1770_s9, %s1192_s20 }
  0x10   : > { %v337_v5 = vld [vmem:[%s1577_s23] sm:$0xff]  ;;  %v338_v6 = vld [vmem:[%s1577_s23 + $0x8] sm:$0xff]  ;;  %v339_v7 = vld [vmem:[%s1577_s23 + $0x10] sm:$0xff]  ;;  %1318 = vmatpush3.bf16.msra.mxu1 %v1437_v4 }
  0x11   : > { %v353_v8 = vpack.c.bf16 %v338_v6, %v337_v5  ;;  %v340_v9 = vld [vmem:[%s1577_s23 + $0x18] sm:$0xff]  ;;  %v341_v10 = vld [vmem:[%s1577_s23 + $0x20] sm:$0xff]  ;;  %v342_v11 = vld [vmem:[%s1577_s23 + $0x28] sm:$0xff]  ;;  %1319 = vmatprep.subr.bf16.mxu1 %v1438_v14 }
  0x12   : > { %v354_v12 = vpack.c.bf16 %v340_v9, %v339_v7  ;;  %v355_v13 = vpack.c.bf16 %v342_v11, %v341_v10  ;;  %v343_v15 = vld [vmem:[%s1577_s23 + $0x30] sm:$0xff]  ;;  %v344_v16 = vld [vmem:[%s1577_s23 + $0x38] sm:$0xff]  ;;  %v345_v17 = vld [vmem:[%s1577_s23 + $0x40] sm:$0xff] }
  0x13   : > { %1297 = vmatprep.mubr.msk.bf16.mxu0 %vm384_vm0, %v353_v8  ;;  %v346_v19 = vld [vmem:[%s1577_s23 + $0x48] sm:$0xff]  ;;  %v356_v20 = vpack.c.bf16 %v344_v16, %v343_v15  ;;  %v347_v23 = vld [vmem:[%s1577_s23 + $0x50] sm:$0xff]  ;;  %v348_v24 = vld [vmem:[%s1577_s23 + $0x58] sm:$0xff] }
  0x14   : > { %1298 = vmatmul.mubr.msk.bf16.vlgmr.msra.gmra.mrb[0].mxu0 %vm384_vm0, %v354_v12  ;;  %v357_v21 = vpack.c.bf16 %v346_v19, %v345_v17  ;;  %1320 = vmatpush3.bf16.msra.mxu1 %v1438_v14  ;;  %v349_v25 = vld [vmem:[%s1577_s23 + $0x60] sm:$0xff]  ;;  %v350_v26 = vld [vmem:[%s1577_s23 + $0x68] sm:$0xff]  ;;  %v358_v27 = vpack.c.bf16 %v348_v24, %v347_v23  ;;  %v351_v29 = vld [vmem:[%s1577_s23 + $0x70] sm:$0xff] }
  0x15   : > { %1301 = vmatprep.mubr.msk.bf16.mxu0 %vm384_vm0, %v355_v13  ;;  %1321 = vmatprep.subr.bf16.mxu1 %v1439_v18  ;;  %v359_v28 = vpack.c.bf16 %v350_v26, %v349_v25  ;;  %v352_v30 = vld [vmem:[%s1577_s23 + $0x78] sm:$0xff] }
  0x16   : > { %v360_v31 = vpack.c.bf16 %v352_v30, %v351_v29  ;;  %1346 = vmatpush3.bf16.msra.mxu0 %v1443_v34  ;;  %v1450_v34 = vld [vmem:[%s1766_s5 + $0x38] sm:$0xff]  }
  0x17   : > { %1347 = vmatprep.subr.bf16.mxu0 %v1444_v35 }
  0x18   : > { %1322 = vmatpush3.bf16.msra.mxu1 %v1439_v18 }
  0x19   : > { %1323 = vmatprep.subr.bf16.mxu1 %v1440_v22 }
  0x1a   : > { %1348 = vmatpush3.bf16.msra.mxu0 %v1444_v35  ;;  %v1451_v35 = vld [vmem:[%s1768_s7] sm:$0xff]  }
  0x1b   : > { %1349 = vmatprep.subr.bf16.mxu0 %v1445_v36 }
  0x1c   : > { %1302 = vmatmul.mubr.msk.bf16.gmra.mrb[4].mxu0 %vm384_vm0, %v356_v20  ;;  %1324 = vmatpush3.bf16.msra.mxu1 %v1440_v22 }
  0x1d   : > { %1305 = vmatprep.mubr.msk.bf16.mxu0 %vm384_vm0, %v357_v21  ;;  %1325 = vmatprep.subr.bf16.mxu1 %v1441_v32 }
  0x1e   : > { %1350 = vmatpush3.bf16.msra.mxu0 %v1445_v36  ;;  %v1452_v36 = vld [vmem:[%s1768_s7 + $0x8] sm:$0xff]  }
  0x1f   : > { %1351 = vmatprep.subr.bf16.mxu0 %v1446_v37 }
  0x20   : > { %1326 = vmatpush3.bf16.msra.mxu1 %v1441_v32 }
  0x21   : > { %1327 = vmatprep.subr.bf16.mxu1 %v1442_v33 }
  0x22   : > { %1352 = vmatpush3.bf16.msra.mxu0 %v1446_v37  ;;  %v1453_v37 = vld [vmem:[%s1768_s7 + $0x10] sm:$0xff]  }
  0x23   : > { %1353 = vmatprep.subr.bf16.mxu0 %v1447_v38 }
  0x24   : > { %1306 = vmatmul.mubr.msk.bf16.gmra.mrb[8].mxu0 %vm384_vm0, %v358_v27  ;;  %1328 = vmatpush3.bf16.msra.mxu1 %v1442_v33  ;;  %v1449_v33 = vld [vmem:[%s1766_s5 + $0x30] sm:$0xff]  }
  0x25   : > { %1309 = vmatprep.mubr.msk.bf16.mxu0 %vm384_vm0, %v359_v28  ;;  %1409 = vmatprep.subr.bf16.mxu1 %v1451_v35 }
  0x26   : > { %1354 = vmatpush3.bf16.msra.mxu0 %v1447_v38  ;;  %v1660_v38 = vld [vmem:[%s1768_s7 + $0x18] sm:$0xff]  }
  0x27   : > { %1355 = vmatprep.subr.bf16.mxu0 %v1448_v39 }
  0x2a   : > { %1356 = vmatpush3.bf16.msra.mxu0 %v1448_v39  ;;  %v1666_v39 = vld [vmem:[%s1768_s7 + $0x20] sm:$0xff]  }
  0x2b   : > { %1357 = vmatprep.subr.bf16.mxu0 %v1449_v33 }
  0x2c   : > { %1310 = vmatmul.mubr.msk.bf16.gmra.mrb[12].mxu0 %vm384_vm0, %v360_v31 }
  0x2e   : > { %1358 = vmatpush3.bf16.msra.mxu0 %v1449_v33 }
  0x2f   : > { %1359 = vmatprep.subr.bf16.mxu0 %v1450_v34 }
  0x32   : > { %1360 = vmatpush3.bf16.msra.mxu0 %v1450_v34  ;;  %v1457_v34 = vld [vmem:[%s1768_s7 + $0x30] sm:$0xff]  }
  0x33   : > { %1377 = vmatprep.subr.bf16.mxu0 %v1451_v35 }
  0xe7   : > { %v1299_v41 = vpop.f32.mrb[0].mxu0 }
  0xe8   : > { %v452_v42 = vadd.f32 %v1299_v41, %v1195_v40  ;;  %v443_v43 = vpop.f32.mrb[1].mxu0  ;;  %v1681_v41 = vld [vmem:[%s1765_s4] ss:$0 sm:$0xff] }
  0xe9   : > { %v444_v44 = vadd.f32 %v1195_v40, %v443_v43  ;;  %v1300_v45 = vpop.f32.mrb[2].mxu0 }
  0xea   : > { %v455_v46 = vadd.f32 %v1300_v45, %v1195_v40  ;;  %v446_v47 = vpop.f32.mrb[3].mxu0  ;;  %v508_v49 = vmax.f32 %v452_v42, 0.0 }
  0xeb   : > { %v447_v48 = vadd.f32 %v1195_v40, %v446_v47  ;;  %v506_v51 = vmax.f32 %v444_v44, 0.0 }
  0xec   : > { %v509_v50 = vmax.f32 %v455_v46, 0.0 }
  0xed   : > { %v507_v52 = vmax.f32 %v447_v48, 0.0 }
  0xee   : > { %v523_v53 = vpack.c.bf16 %v509_v50, %v508_v49 }
  0xef   : > { %v1303_v54 = vpop.f32.mrb[4].mxu0  ;;  %v522_v55 = vpack.c.bf16 %v507_v52, %v506_v51 }
  0xf0   : > { %v468_v56 = vadd.f32 %v1303_v54, %v1195_v40  ;;  %v459_v57 = vpop.f32.mrb[5].mxu0 }
  0xf1   : > { %v460_v58 = vadd.f32 %v1195_v40, %v459_v57  ;;  %v1304_v59 = vpop.f32.mrb[6].mxu0  ;;  %1329 = vmatprep.mubr.bf16.mxu1 %v522_v55 }
  0xf2   : > { %v471_v60 = vadd.f32 %v1304_v59, %v1195_v40  ;;  %v462_v61 = vpop.f32.mrb[7].mxu0  ;;  %1330 = vmatmul.mubr.bf16.vlgmr.msra.gmra.mrb[0].mxu1 %v523_v53  ;;  %v512_v63 = vmax.f32 %v468_v56, 0.0 }
  0xf3   : > { %v463_v62 = vadd.f32 %v1195_v40, %v462_v61  ;;  %v510_v1 = vmax.f32 %v460_v58, 0.0  ;;  %1417 = vmatpush3.bf16.msra.mxu1 %v1451_v35 }
  0xf4   : > { %v513_v0 = vmax.f32 %v471_v60, 0.0  ;;  %1410 = vmatprep.subr.bf16.mxu1 %v1452_v36 }
  0xf5   : > { %v511_v2 = vmax.f32 %v463_v62, 0.0 }
  0xf6   : > { %v525_v3 = vpack.c.bf16 %v513_v0, %v512_v63 }
  0xf7   : > { %v524_v4 = vpack.c.bf16 %v511_v2, %v510_v1  ;;  %v1307_v5 = vpop.f32.mrb[8].mxu0  ;;  %1418 = vmatpush3.bf16.msra.mxu1 %v1452_v36 }
  0xf8   : > { %v484_v6 = vadd.f32 %v1307_v5, %v1195_v40  ;;  %v475_v7 = vpop.f32.mrb[9].mxu0  ;;  %1411 = vmatprep.subr.bf16.mxu1 %v1453_v37 }
  0xf9   : > { %v476_v8 = vadd.f32 %v1195_v40, %v475_v7  ;;  %v1308_v9 = vpop.f32.mrb[10].mxu0  ;;  %1333 = vmatprep.mubr.bf16.mxu1 %v524_v4 }
  0xfa   : > { %v487_v10 = vadd.f32 %v1308_v9, %v1195_v40  ;;  %v478_v11 = vpop.f32.mrb[11].mxu0  ;;  %1334 = vmatmul.mubr.bf16.gmra.mrb[4].mxu1 %v525_v3  ;;  %v516_v13 = vmax.f32 %v484_v6, 0.0 }
  0xfb   : > { %v479_v12 = vadd.f32 %v1195_v40, %v478_v11  ;;  %v514_v15 = vmax.f32 %v476_v8, 0.0  ;;  %1419 = vmatpush3.bf16.msra.mxu1 %v1453_v37 }
  0xfc   : > { %v517_v14 = vmax.f32 %v487_v10, 0.0  ;;  %1412 = vmatprep.subr.bf16.mxu1 %v1660_v38 }
  0xfd   : > { %v515_v16 = vmax.f32 %v479_v12, 0.0 }
  0xfe   : > { %v527_v17 = vpack.c.bf16 %v517_v14, %v516_v13 }
  0xff   : > { %v526_v18 = vpack.c.bf16 %v515_v16, %v514_v15  ;;  %v1311_v19 = vpop.f32.mrb[12].mxu0  ;;  %1420 = vmatpush3.bf16.msra.mxu1 %v1660_v38 }
 0x100   : > { %v500_v20 = vadd.f32 %v1311_v19, %v1195_v40  ;;  %v491_v21 = vpop.f32.mrb[13].mxu0  ;;  %1413 = vmatprep.subr.bf16.mxu1 %v1666_v39 }
 0x101   : > { %v492_v22 = vadd.f32 %v1195_v40, %v491_v21  ;;  %v1312_v23 = vpop.f32.mrb[14].mxu0  ;;  %1337 = vmatprep.mubr.bf16.mxu1 %v526_v18 }
 0x102   : > { %v503_v24 = vadd.f32 %v1312_v23, %v1195_v40  ;;  %v494_v25 = vpop.f32.mrb[15].mxu0  ;;  %1338 = vmatmul.mubr.bf16.gmra.mrb[8].mxu1 %v527_v17  ;;  %v520_v27 = vmax.f32 %v500_v20, 0.0 }
 0x103   : > { %v495_v26 = vadd.f32 %v1195_v40, %v494_v25  ;;  %v518_v29 = vmax.f32 %v492_v22, 0.0  ;;  %v1673_v40 = vld [vmem:[%s1768_s7 + $0x28] sm:$0xff]   ;;  %1421 = vmatpush3.bf16.msra.mxu1 %v1666_v39 }
 0x104   : > { %v521_v28 = vmax.f32 %v503_v24, 0.0  ;;  %1414 = vmatprep.subr.bf16.mxu1 %v1673_v40 }
 0x105   : > { %v519_v30 = vmax.f32 %v495_v26, 0.0 }
 0x106   : > { %v529_v31 = vpack.c.bf16 %v521_v28, %v520_v27 }
 0x107   : > { %v528_v32 = vpack.c.bf16 %v519_v30, %v518_v29  ;;  %1422 = vmatpush3.bf16.msra.mxu1 %v1673_v40 }
 0x108   : > { %1415 = vmatprep.subr.bf16.mxu1 %v1457_v34 }
 0x109   : > { %1341 = vmatprep.mubr.bf16.mxu1 %v528_v32 }
 0x10a   : > { %1342 = vmatmul.mubr.bf16.gmra.mrb[12].mxu1 %v529_v31 }
 0x10b   : > { %1423 = vmatpush3.bf16.msra.mxu1 %v1457_v34 }
 0x1c5   : > { %v1331_v42 = vpop.f32.mrb[0].mxu1 }
 0x1c6   : > { %v644_v43 = vadd.f32 %v1331_v42, %v1681_v41  ;;  %v635_v44 = vpop.f32.mrb[1].mxu1 }
 0x1c7   : > { %v636_v45 = vadd.f32 %v1681_v41, %v635_v44  ;;  %v1332_v46 = vpop.f32.mrb[2].mxu1 }
 0x1c8   : > { %v647_v47 = vadd.f32 %v1332_v46, %v1681_v41  ;;  %v638_v48 = vpop.f32.mrb[3].mxu1  ;;  %v700_v50 = vmax.f32 %v644_v43, 0.0 }
 0x1c9   : > { %v639_v49 = vadd.f32 %v1681_v41, %v638_v48  ;;  %v698_v52 = vmax.f32 %v636_v45, 0.0 }
 0x1ca   : > { %v701_v51 = vmax.f32 %v647_v47, 0.0 }
 0x1cb   : > { %v699_v53 = vmax.f32 %v639_v49, 0.0 }
 0x1cc   : > { %v715_v54 = vpack.c.bf16 %v701_v51, %v700_v50 }
 0x1cd   : > { %v714_v55 = vpack.c.bf16 %v699_v53, %v698_v52  ;;  %v1335_v56 = vpop.f32.mrb[4].mxu1 }
 0x1ce   : > { %v660_v57 = vadd.f32 %v1335_v56, %v1681_v41  ;;  %v651_v58 = vpop.f32.mrb[5].mxu1 }
 0x1cf   : > { %v652_v59 = vadd.f32 %v1681_v41, %v651_v58  ;;  %v1336_v60 = vpop.f32.mrb[6].mxu1  ;;  %1361 = vmatprep.mubr.bf16.mxu0 %v714_v55 }
 0x1d0   : > { %v663_v61 = vadd.f32 %v1336_v60, %v1681_v41  ;;  %v654_v62 = vpop.f32.mrb[7].mxu1  ;;  %1362 = vmatmul.mubr.bf16.vlgmr.msra.gmra.mrb[16].mxu0 %v715_v54  ;;  %v704_v0 = vmax.f32 %v660_v57, 0.0 }
 0x1d1   : > { %v655_v63 = vadd.f32 %v1681_v41, %v654_v62  ;;  %1378 = vmatpush3.bf16.msra.mxu0 %v1451_v35  ;;  %v702_v2 = vmax.f32 %v652_v59, 0.0  ;;  %v1458_v35 = vld [vmem:[%s1768_s7 + $0x38] sm:$0xff]  }
 0x1d2   : > { %v705_v1 = vmax.f32 %v663_v61, 0.0  ;;  %1379 = vmatprep.subr.bf16.mxu0 %v1452_v36  ;;  %1416 = vmatprep.subr.bf16.mxu1 %v1458_v35 }
 0x1d3   : > { %v703_v3 = vmax.f32 %v655_v63, 0.0  ;;  %1424 = vmatpush3.bf16.msra.mxu1 %v1458_v35 }
 0x1d4   : > { %v717_v4 = vpack.c.bf16 %v705_v1, %v704_v0 }
 0x1d5   : > { %v716_v5 = vpack.c.bf16 %v703_v3, %v702_v2  ;;  %v1339_v6 = vpop.f32.mrb[8].mxu1  ;;  %1380 = vmatpush3.bf16.msra.mxu0 %v1452_v36  ;;  %v1215_v36 = vld [vmem:[%s1767_s6] ss:$0 sm:$0xff] }
 0x1d6   : > { %v676_v7 = vadd.f32 %v1339_v6, %v1681_v41  ;;  %v667_v8 = vpop.f32.mrb[9].mxu1  ;;  %1381 = vmatprep.subr.bf16.mxu0 %v1453_v37 }
 0x1d7   : > { %v668_v9 = vadd.f32 %v1681_v41, %v667_v8  ;;  %v1340_v10 = vpop.f32.mrb[10].mxu1  ;;  %1365 = vmatprep.mubr.bf16.mxu0 %v716_v5 }
 0x1d8   : > { %v679_v11 = vadd.f32 %v1340_v10, %v1681_v41  ;;  %v670_v12 = vpop.f32.mrb[11].mxu1  ;;  %1366 = vmatmul.mubr.bf16.gmra.mrb[20].mxu0 %v717_v4  ;;  %v708_v14 = vmax.f32 %v676_v7, 0.0 }
 0x1d9   : > { %v671_v13 = vadd.f32 %v1681_v41, %v670_v12  ;;  %1382 = vmatpush3.bf16.msra.mxu0 %v1453_v37  ;;  %v706_v16 = vmax.f32 %v668_v9, 0.0 }
 0x1da   : > { %v709_v15 = vmax.f32 %v679_v11, 0.0  ;;  %1383 = vmatprep.subr.bf16.mxu0 %v1660_v38 }
 0x1db   : > { %v707_v17 = vmax.f32 %v671_v13, 0.0 }
 0x1dc   : > { %v719_v18 = vpack.c.bf16 %v709_v15, %v708_v14 }
 0x1dd   : > { %v718_v19 = vpack.c.bf16 %v707_v17, %v706_v16  ;;  %v1343_v20 = vpop.f32.mrb[12].mxu1  ;;  %1384 = vmatpush3.bf16.msra.mxu0 %v1660_v38 }
 0x1de   : > { %v692_v21 = vadd.f32 %v1343_v20, %v1681_v41  ;;  %v683_v22 = vpop.f32.mrb[13].mxu1  ;;  %1385 = vmatprep.subr.bf16.mxu0 %v1666_v39 }
 0x1df   : > { %v684_v23 = vadd.f32 %v1681_v41, %v683_v22  ;;  %v1344_v24 = vpop.f32.mrb[14].mxu1  ;;  %1369 = vmatprep.mubr.bf16.mxu0 %v718_v19 }
 0x1e0   : > { %v695_v25 = vadd.f32 %v1344_v24, %v1681_v41  ;;  %v686_v26 = vpop.f32.mrb[15].mxu1  ;;  %1370 = vmatmul.mubr.bf16.gmra.mrb[24].mxu0 %v719_v18  ;;  %v712_v28 = vmax.f32 %v692_v21, 0.0 }
 0x1e1   : > { %v687_v27 = vadd.f32 %v1681_v41, %v686_v26  ;;  %1386 = vmatpush3.bf16.msra.mxu0 %v1666_v39  ;;  %v710_v30 = vmax.f32 %v684_v23, 0.0 }
 0x1e2   : > { %v713_v29 = vmax.f32 %v695_v25, 0.0  ;;  %1387 = vmatprep.subr.bf16.mxu0 %v1673_v40 }
 0x1e3   : > { %v711_v31 = vmax.f32 %v687_v27, 0.0 }
 0x1e4   : > { %v721_v32 = vpack.c.bf16 %v713_v29, %v712_v28  ;;  %v1717_v29 = vld [vmem:[%s1769_s8] ss:$0 sm:$0xff] }
 0x1e5   : > { %v720_v33 = vpack.c.bf16 %v711_v31, %v710_v30  ;;  %1388 = vmatpush3.bf16.msra.mxu0 %v1673_v40 }
 0x1e6   : > { %1389 = vmatprep.subr.bf16.mxu0 %v1457_v34 }
 0x1e7   : > { %1373 = vmatprep.mubr.bf16.mxu0 %v720_v33 }
 0x1e8   : > { %1374 = vmatmul.mubr.bf16.gmra.mrb[28].mxu0 %v721_v32 }
 0x1e9   : > { %1390 = vmatpush3.bf16.msra.mxu0 %v1457_v34 }
 0x1ea   : > { %1391 = vmatprep.subr.bf16.mxu0 %v1458_v35 }
 0x1ed   : > { %1392 = vmatpush3.bf16.msra.mxu0 %v1458_v35 }
 0x2a3   : > { %v1363_v37 = vpop.f32.mrb[16].mxu0 }
 0x2a4   : > { %v836_v38 = vadd.f32 %v1363_v37, %v1215_v36  ;;  %v827_v39 = vpop.f32.mrb[17].mxu0 }
 0x2a5   : > { %v828_v40 = vadd.f32 %v1215_v36, %v827_v39  ;;  %v1364_v41 = vpop.f32.mrb[18].mxu0 }
 0x2a6   : > { %v839_v42 = vadd.f32 %v1364_v41, %v1215_v36  ;;  %v830_v43 = vpop.f32.mrb[19].mxu0  ;;  %v892_v45 = vmax.f32 %v836_v38, 0.0 }
 0x2a7   : > { %v831_v44 = vadd.f32 %v1215_v36, %v830_v43  ;;  %v890_v47 = vmax.f32 %v828_v40, 0.0 }
 0x2a8   : > { %v893_v46 = vmax.f32 %v839_v42, 0.0 }
 0x2a9   : > { %v891_v48 = vmax.f32 %v831_v44, 0.0 }
 0x2aa   : > { %v907_v49 = vpack.c.bf16 %v893_v46, %v892_v45 }
 0x2ab   : > { %v906_v50 = vpack.c.bf16 %v891_v48, %v890_v47  ;;  %v1367_v51 = vpop.f32.mrb[20].mxu0 }
 0x2ac   : > { %v852_v52 = vadd.f32 %v1367_v51, %v1215_v36  ;;  %v843_v53 = vpop.f32.mrb[21].mxu0 }
 0x2ad   : > { %v844_v54 = vadd.f32 %v1215_v36, %v843_v53  ;;  %v1368_v55 = vpop.f32.mrb[22].mxu0  ;;  %1393 = vmatprep.mubr.bf16.mxu0 %v906_v50 }
 0x2ae   : > { %v855_v56 = vadd.f32 %v1368_v55, %v1215_v36  ;;  %v846_v57 = vpop.f32.mrb[23].mxu0  ;;  %1394 = vmatmul.mubr.bf16.vlgmr.msra.gmra.mrb[32].mxu0 %v907_v49  ;;  %v896_v59 = vmax.f32 %v852_v52, 0.0 }
 0x2af   : > { %v847_v58 = vadd.f32 %v1215_v36, %v846_v57  ;;  %v894_v61 = vmax.f32 %v844_v54, 0.0 }
 0x2b0   : > { %v897_v60 = vmax.f32 %v855_v56, 0.0 }
 0x2b1   : > { %v895_v62 = vmax.f32 %v847_v58, 0.0 }
 0x2b2   : > { %v909_v63 = vpack.c.bf16 %v897_v60, %v896_v59 }
 0x2b3   : > { %v908_v0 = vpack.c.bf16 %v895_v62, %v894_v61  ;;  %v1371_v1 = vpop.f32.mrb[24].mxu0 }
 0x2b4   : > { %v868_v2 = vadd.f32 %v1371_v1, %v1215_v36  ;;  %v859_v3 = vpop.f32.mrb[25].mxu0 }
 0x2b5   : > { %v860_v4 = vadd.f32 %v1215_v36, %v859_v3  ;;  %v1372_v5 = vpop.f32.mrb[26].mxu0  ;;  %1397 = vmatprep.mubr.bf16.mxu1 %v908_v0 }
 0x2b6   : > { %v871_v6 = vadd.f32 %v1372_v5, %v1215_v36  ;;  %v862_v7 = vpop.f32.mrb[27].mxu0  ;;  %1398 = vmatmul.mubr.bf16.vlgmr.msra.gmra.mrb[16].mxu1 %v909_v63  ;;  %v900_v9 = vmax.f32 %v868_v2, 0.0 }
 0x2b7   : > { %v863_v8 = vadd.f32 %v1215_v36, %v862_v7  ;;  %v898_v11 = vmax.f32 %v860_v4, 0.0 }
 0x2b8   : > { %v901_v10 = vmax.f32 %v871_v6, 0.0 }
 0x2b9   : > { %v899_v12 = vmax.f32 %v863_v8, 0.0 }
 0x2ba   : > { %v911_v13 = vpack.c.bf16 %v901_v10, %v900_v9 }
 0x2bb   : > { %v910_v14 = vpack.c.bf16 %v899_v12, %v898_v11  ;;  %v1375_v15 = vpop.f32.mrb[28].mxu0 }
 0x2bc   : > { %v884_v16 = vadd.f32 %v1375_v15, %v1215_v36  ;;  %v875_v17 = vpop.f32.mrb[29].mxu0 }
 0x2bd   : > { %v876_v18 = vadd.f32 %v1215_v36, %v875_v17  ;;  %v1376_v19 = vpop.f32.mrb[30].mxu0  ;;  %1401 = vmatprep.mubr.bf16.mxu1 %v910_v14 }
 0x2be   : > { %v887_v20 = vadd.f32 %v1376_v19, %v1215_v36  ;;  %v878_v21 = vpop.f32.mrb[31].mxu0  ;;  %1402 = vmatmul.mubr.bf16.gmra.mrb[20].mxu1 %v911_v13  ;;  %v904_v23 = vmax.f32 %v884_v16, 0.0 }
 0x2bf   : > { %v879_v22 = vadd.f32 %v1215_v36, %v878_v21  ;;  %v902_v25 = vmax.f32 %v876_v18, 0.0 }
 0x2c0   : > { %v905_v24 = vmax.f32 %v887_v20, 0.0 }
 0x2c1   : > { %v903_v26 = vmax.f32 %v879_v22, 0.0 }
 0x2c2   : > { %v913_v27 = vpack.c.bf16 %v905_v24, %v904_v23 }
 0x2c3   : > { %v912_v28 = vpack.c.bf16 %v903_v26, %v902_v25 }
 0x2c5   : > { %1405 = vmatprep.mubr.bf16.mxu1 %v912_v28 }
 0x2c6   : > { %1406 = vmatmul.mubr.bf16.gmra.mrb[24].mxu1 %v913_v27 }
 0x381   : > { %v1395_v30 = vpop.f32.mrb[32].mxu0 }
 0x382   : > { %v1028_v31 = vadd.f32 %v1395_v30, %v1717_v29  ;;  %v1019_v32 = vpop.f32.mrb[33].mxu0 }
 0x383   : > { %v1020_v33 = vadd.f32 %v1717_v29, %v1019_v32  ;;  %v1396_v34 = vpop.f32.mrb[34].mxu0 }
 0x384   : > { %1459 = vtanh.f32 %v1028_v31  ;;  %v1031_v35 = vadd.f32 %v1396_v34, %v1717_v29  ;;  %v1022_v36 = vpop.f32.mrb[35].mxu0 }
 0x385   : > { %1461 = vtanh.f32 %v1020_v33  ;;  %v1023_v37 = vadd.f32 %v1717_v29, %v1022_v36 }
 0x386   : > { %1463 = vtanh.f32 %v1031_v35 }
 0x387   : > { %1465 = vtanh.f32 %v1023_v37 }
 0x389   : > { %v1399_v38 = vpop.f32.mrb[16].mxu1 }
 0x38a   : > { %v1044_v39 = vadd.f32 %v1399_v38, %v1717_v29  ;;  %v1035_v40 = vpop.f32.mrb[17].mxu1 }
 0x38b   : > { %v1036_v41 = vadd.f32 %v1717_v29, %v1035_v40  ;;  %v1400_v42 = vpop.f32.mrb[18].mxu1 }
 0x38c   : > { %1467 = vtanh.f32 %v1044_v39  ;;  %v1047_v43 = vadd.f32 %v1400_v42, %v1717_v29  ;;  %v1038_v44 = vpop.f32.mrb[19].mxu1 }
 0x38d   : > { %1469 = vtanh.f32 %v1036_v41  ;;  %v1039_v45 = vadd.f32 %v1717_v29, %v1038_v44 }
 0x38e   : > { %v1460_v46 = vpop.eup %1459  ;;  %1471 = vtanh.f32 %v1047_v43 }
 0x38f   : > { %v1462_v47 = vpop.eup %1461  ;;  %v1100_v48 = vmul.f32 2.0, %v1460_v46  ;;  %1473 = vtanh.f32 %v1039_v45 }
 0x390   : > { %v1464_v49 = vpop.eup %1463  ;;  %v1098_v50 = vmul.f32 2.0, %v1462_v47 }
 0x391   : > { %v1466_v51 = vpop.eup %1465  ;;  %1116 = vst [vmem:[%s1732_s24 + $0x10] sm:$0xff] %v1100_v48  ;;  %v1101_v52 = vmul.f32 2.0, %v1464_v49  ;;  %v1403_v53 = vpop.f32.mrb[20].mxu1 }
 0x392   : > { %1114 = vst [vmem:[%s1732_s24] sm:$0xff] %v1098_v50  ;;  %v1099_v54 = vmul.f32 2.0, %v1466_v51  ;;  %v1060_v55 = vadd.f32 %v1403_v53, %v1717_v29  ;;  %v1051_v56 = vpop.f32.mrb[21].mxu1 }
 0x393   : > { %1117 = vst [vmem:[%s1732_s24 + $0x18] sm:$0xff] %v1101_v52  ;;  %v1052_v57 = vadd.f32 %v1717_v29, %v1051_v56  ;;  %v1404_v58 = vpop.f32.mrb[22].mxu1 }
 0x394   : > { %1115 = vst [vmem:[%s1732_s24 + $0x8] sm:$0xff] %v1099_v54  ;;  %1475 = vtanh.f32 %v1060_v55  ;;  %v1063_v59 = vadd.f32 %v1404_v58, %v1717_v29  ;;  %v1054_v60 = vpop.f32.mrb[23].mxu1 }
 0x395   : > { %1477 = vtanh.f32 %v1052_v57  ;;  %v1055_v61 = vadd.f32 %v1717_v29, %v1054_v60 }
 0x396   : > { %v1468_v62 = vpop.eup %1467  ;;  %1479 = vtanh.f32 %v1063_v59 }
 0x397   : > { %v1470_v63 = vpop.eup %1469  ;;  %v1104_v0 = vmul.f32 2.0, %v1468_v62  ;;  %1481 = vtanh.f32 %v1055_v61 }
 0x398   : > { %v1472_v1 = vpop.eup %1471  ;;  %v1102_v2 = vmul.f32 2.0, %v1470_v63 }
 0x399   : > { %v1474_v3 = vpop.eup %1473  ;;  %1120 = vst [vmem:[%s1732_s24 + $0x30] sm:$0xff] %v1104_v0  ;;  %v1105_v4 = vmul.f32 2.0, %v1472_v1  ;;  %v1407_v5 = vpop.f32.mrb[24].mxu1 }
 0x39a   : > { %1118 = vst [vmem:[%s1732_s24 + $0x20] sm:$0xff] %v1102_v2  ;;  %v1103_v6 = vmul.f32 2.0, %v1474_v3  ;;  %v1076_v7 = vadd.f32 %v1407_v5, %v1717_v29  ;;  %v1067_v8 = vpop.f32.mrb[25].mxu1 }
 0x39b   : > { %1121 = vst [vmem:[%s1732_s24 + $0x38] sm:$0xff] %v1105_v4  ;;  %v1068_v9 = vadd.f32 %v1717_v29, %v1067_v8  ;;  %v1408_v10 = vpop.f32.mrb[26].mxu1 }
 0x39c   : > { %1119 = vst [vmem:[%s1732_s24 + $0x28] sm:$0xff] %v1103_v6  ;;  %1483 = vtanh.f32 %v1076_v7  ;;  %v1079_v11 = vadd.f32 %v1408_v10, %v1717_v29  ;;  %v1070_v12 = vpop.f32.mrb[27].mxu1 }
 0x39d   : > { %1485 = vtanh.f32 %v1068_v9  ;;  %v1071_v13 = vadd.f32 %v1717_v29, %v1070_v12 }
 0x39e   : > { %v1476_v14 = vpop.eup %1475  ;;  %1487 = vtanh.f32 %v1079_v11 }
 0x39f   : > { %v1478_v15 = vpop.eup %1477  ;;  %v1108_v16 = vmul.f32 2.0, %v1476_v14  ;;  %1489 = vtanh.f32 %v1071_v13 }
 0x3a0   : > { %v1480_v17 = vpop.eup %1479  ;;  %v1106_v18 = vmul.f32 2.0, %v1478_v15 }
 0x3a1   : > { %v1482_v19 = vpop.eup %1481  ;;  %1124 = vst [vmem:[%s1732_s24 + $0x50] sm:$0xff] %v1108_v16  ;;  %v1109_v20 = vmul.f32 2.0, %v1480_v17 }
 0x3a2   : > { %1122 = vst [vmem:[%s1732_s24 + $0x40] sm:$0xff] %v1106_v18  ;;  %v1107_v21 = vmul.f32 2.0, %v1482_v19 }
 0x3a3   : > { %1125 = vst [vmem:[%s1732_s24 + $0x58] sm:$0xff] %v1109_v20 }
 0x3a4   : > { %1123 = vst [vmem:[%s1732_s24 + $0x48] sm:$0xff] %v1107_v21 }
 0x3a6   : > { %v1484_v22 = vpop.eup %1483 }
 0x3a7   : > { %v1486_v23 = vpop.eup %1485  ;;  %v1112_v24 = vmul.f32 2.0, %v1484_v22 }
 0x3a8   : > { %v1488_v25 = vpop.eup %1487  ;;  %v1110_v26 = vmul.f32 2.0, %v1486_v23 }
 0x3a9   : > { %v1490_v27 = vpop.eup %1489  ;;  %1128 = vst [vmem:[%s1732_s24 + $0x70] sm:$0xff] %v1112_v24  ;;  %v1113_v28 = vmul.f32 2.0, %v1488_v25 }
 0x3aa   : > { %1126 = vst [vmem:[%s1732_s24 + $0x60] sm:$0xff] %v1110_v26  ;;  %v1111_v29 = vmul.f32 2.0, %v1490_v27 }
 0x3ab   : > { %1129 = vst [vmem:[%s1732_s24 + $0x78] sm:$0xff] %v1113_v28 }
 0x3ac   : > { %1127 = vst [vmem:[%s1732_s24 + $0x68] sm:$0xff] %v1111_v29 }
 0x3ad PF: > { %s19_s30 = sadd.s32 1, %s1497_s30  }
 0x3ae   : > { %p16_p4 = scmp.ge.s32.totalorder %s19_s30, 4  }
 0x3b0   :  { %18 = sbr.rel (!%p16_p4) target bundleno = 1 (0x1), region = 86 }

</bundles_post_ra>
